<compile_context>
chip_gen: v7x
topology: tpu7x:2x2x1
jax: 0.10.0
libtpu: 0.0.40
codegen_flags: <defaults>
</compile_context>

<pallas_src>
import functools

import jax
import jax.numpy as jnp
import numpy as np
from jax import lax
from jax.experimental import pallas as pl
from jax.experimental.pallas import tpu as pltpu


def _lora_conv_kernel(p_ref, w_ref, a_ref, b_ref, bias_ref, o_ref, *, scaling):
    """One batch image per grid step.

    p_ref:    (1, K, HW)    f32  im2col patches (K = Cin*kh*kw, channel-major)
    w_ref:    (Cout, K)     f32  conv weight, flattened OIHW
    a_ref:    (r, K)        f32  LoRA A
    b_ref:    (Cout, r)     f32  LoRA B
    bias_ref: (Cout, 1)     f32
    o_ref:    (1, Cout, HW) f32
    """
    # LoRA-adjusted weight, recomputed each step: rank-r GEMM is negligible and
    # far cheaper than a second pallas_call launch + HBM round trip of W_adj.
    lora = jnp.dot(b_ref[...], a_ref[...], preferred_element_type=jnp.float32)
    w_adj = w_ref[...] + scaling * lora                       # (Cout, K), f32

    # (Cout, K) @ (K, HW) -> (Cout, HW): HW on the lane axis => lane-dense,
    # unmasked output stores; fills the 256-wide MXU lane dim on v6e/v7x.
    acc = jnp.dot(w_adj, p_ref[0], preferred_element_type=jnp.float32)
    o_ref[0] = acc + bias_ref[...]                            # bias broadcast over HW


def lora_conv2d(x, weight, bias, lora_A, lora_B, *,
                stride=1, padding=0, lora_scaling=1.0):
    """x: (N, Cin, H, W) f32; weight: (Cout, Cin, kh, kw); bias: (Cout,).

    Returns conv2d(x, W + s*(B@A).view_as(W), bias) in NCHW.
    """
    N, Cin, H, W = x.shape
    Cout, _, kh, kw = weight.shape
    rank = lora_A.shape[0]
    Hout = (H + 2 * padding - kh) // stride + 1
    Wout = (W + 2 * padding - kw) // stride + 1
    K = Cin * kh * kw
    HW = Hout * Wout

    # im2col as one fused XLA op.  The NCHW out-spec puts the patch/feature dim
    # (channel-major: Cin, kh, kw — same flattening order as weight.reshape)
    # on axis 1, so collapsing spatial dims is a free reshape: (N, K, HW).
    # No pad, no transpose of the patch matrix in HBM.
    # TODO(synk): for large images, do im2col in-kernel (halo DMA per tile,
    # x kept in HBM via memory_space=pl.ANY) to avoid the K-times-amplified
    # patch matrix entirely.
    patches = lax.conv_general_dilated_patches(
        x, (kh, kw), (stride, stride),
        [(padding, padding), (padding, padding)],
        dimension_numbers=("NCHW", "OIHW", "NCHW"),
    ).reshape(N, K, HW)

    w2d = weight.reshape(Cout, K).astype(jnp.float32)
    a2d = lora_A.astype(jnp.float32)
    b2d = lora_B.astype(jnp.float32)
    bias2d = bias.astype(jnp.float32).reshape(Cout, 1)

    # Cost estimate from true (unpadded) sizes.
    cost = pl.CostEstimate(
        flops=2 * N * HW * K * Cout + 2 * N * Cout * rank * K,
        transcendentals=0,
        bytes_accessed=(patches.size * 4 + w2d.size * 4 + a2d.size * 4
                        + b2d.size * 4 + bias2d.size * 4 + N * Cout * HW * 4),
    )

    out = pl.pallas_call(
        functools.partial(_lora_conv_kernel, scaling=lora_scaling),
        out_shape=jax.ShapeDtypeStruct((N, Cout, HW), jnp.float32),
        grid_spec=pltpu.PrefetchScalarGridSpec(
            num_scalar_prefetch=0,
            grid=(N,),                                        # one image per step
            in_specs=[
                pl.BlockSpec((1, K, HW), lambda n: (n, 0, 0)),   # patches tile
                # Loop-invariant operands (constant index_map).  At real conv
                # sizes mark these pipeline_mode=pl.Buffered(1) so they are not
                # double-buffered (matters against v7x's 64 MiB VMEM).
                pl.BlockSpec((Cout, K), lambda n: (0, 0)),       # weight
                pl.BlockSpec((rank, K), lambda n: (0, 0)),       # lora_A
                pl.BlockSpec((Cout, rank), lambda n: (0, 0)),    # lora_B
                pl.BlockSpec((Cout, 1), lambda n: (0, 0)),       # bias
            ],
            out_specs=pl.BlockSpec((1, Cout, HW), lambda n: (n, 0, 0)),
        ),
        compiler_params=pltpu.CompilerParams(
            dimension_semantics=("parallel",),
            # No-op at this size; keeps headroom vs v5e's 16 MiB default scoped
            # VMEM once tiles grow.
            vmem_limit_bytes=32 * 1024 * 1024,
        ),
        cost_estimate=cost,
    )(patches, w2d, a2d, b2d, bias2d)

    # (N, Cout, HW) -> NCHW is a free reshape: no transpose, no padded slice.
    return out.reshape(N, Cout, Hout, Wout)


if __name__ == "__main__":
    # Module config: Conv2d(4 -> 8, kernel (3,3), stride 1, padding 1), rank 4
    N, Cin, H, W = 2, 4, 16, 16
    Cout, kh, kw = 8, 3, 3
    rank = 4
    stride, padding, scaling = 1, 1, 1.0

    key = jax.random.PRNGKey(0)
    kx, kw_, kb, ka, kbb = jax.random.split(key, 5)
    x = jax.random.normal(kx, (N, Cin, H, W), jnp.float32)
    weight = jax.random.normal(kw_, (Cout, Cin, kh, kw), jnp.float32) * 0.1
    bias = jax.random.normal(kb, (Cout,), jnp.float32) * 0.1
    lora_A = jax.random.normal(ka, (rank, Cin * kh * kw), jnp.float32) * 0.02
    # nn.init zeros lora_B; use small nonzero values so the LoRA path is exercised.
    lora_B = jax.random.normal(kbb, (Cout, rank), jnp.float32) * 0.05

    out = lora_conv2d(x, weight, bias, lora_A, lora_B,
                      stride=stride, padding=padding, lora_scaling=scaling)
    out = jax.block_until_ready(out)
    assert out.shape == (N, Cout, H, W), out.shape

    # reference: f32 conv2d with the LoRA-adjusted weight
    adj_w = weight + scaling * (lora_B @ lora_A).reshape(weight.shape)
    ref = lax.conv_general_dilated(
        x, adj_w, (stride, stride), [(padding, padding), (padding, padding)],
        dimension_numbers=("NCHW", "OIHW", "NCHW"),
        precision=jax.lax.Precision.HIGHEST,
    ) + bias[None, :, None, None]

    # All-f32 kernel path; tolerance covers reduced-precision MXU pass modes.
    np.testing.assert_allclose(np.asarray(out), np.asarray(ref), rtol=2e-2, atol=2e-2)
    print("KERNEL_OK")
</pallas_src>

<mosaic_0001>
module attributes {stable_mosaic.version = 11 : i64} {
  func.func @_lora_conv_kernel(%arg0: i32, %arg1: memref<1x36x256xf32, #tpu.memory_space<vmem>>, %arg2: memref<8x36xf32, #tpu.memory_space<vmem>>, %arg3: memref<4x36xf32, #tpu.memory_space<vmem>>, %arg4: memref<8x4xf32, #tpu.memory_space<vmem>>, %arg5: memref<8x1xf32, #tpu.memory_space<vmem>>, %arg6: memref<1x8x256xf32, #tpu.memory_space<vmem>>) attributes {dimension_semantics = [#tpu.dimension_semantics<parallel>], iteration_bounds = array<i64: 2>, scalar_prefetch = 0 : i64, scratch_operands = 0 : i64, tpu.core_type = #tpu.core_type<tc>, window_params = [{transform_indices = @transform_0, window_bounds = array<i64: 1, 36, 256>}, {pipeline_mode = #tpu.pipeline_mode<synchronous>, transform_indices = @transform_1, window_bounds = array<i64: 8, 36>}, {pipeline_mode = #tpu.pipeline_mode<synchronous>, transform_indices = @transform_2, window_bounds = array<i64: 4, 36>}, {pipeline_mode = #tpu.pipeline_mode<synchronous>, transform_indices = @transform_3, window_bounds = array<i64: 8, 4>}, {pipeline_mode = #tpu.pipeline_mode<synchronous>, transform_indices = @transform_4, window_bounds = array<i64: 8, 1>}, {transform_indices = @transform_5, window_bounds = array<i64: 1, 8, 256>}]} {
    %c0 = arith.constant 0 : index
    %c0_0 = arith.constant 0 : index
    %0 = vector.load %arg4[%c0, %c0_0] : memref<8x4xf32, #tpu.memory_space<vmem>>, vector<8x4xf32>
    %c0_1 = arith.constant 0 : index
    %c0_2 = arith.constant 0 : index
    %1 = vector.load %arg3[%c0_1, %c0_2] : memref<4x36xf32, #tpu.memory_space<vmem>>, vector<4x36xf32>
    %cst = arith.constant dense<0.000000e+00> : vector<8x36xf32>
    %2 = tpu.matmul %0, %1, %cst {dimension_numbers = #tpu.dot_dimension_numbers<[1], [0], [0], [1], [0, 0, 1, 1], [], []>} : vector<8x4xf32>, vector<4x36xf32>, vector<8x36xf32> -> vector<8x36xf32>
    %c0_3 = arith.constant 0 : index
    %c0_4 = arith.constant 0 : index
    %3 = vector.load %arg2[%c0_3, %c0_4] : memref<8x36xf32, #tpu.memory_space<vmem>>, vector<8x36xf32>
    %cst_5 = arith.constant 1.000000e+00 : f32
    %4 = vector.broadcast %cst_5 : f32 to vector<8x36xf32>
    %5 = arith.mulf %4, %2 : vector<8x36xf32>
    %6 = arith.addf %3, %5 : vector<8x36xf32>
    %c0_6 = arith.constant 0 : index
    %c0_7 = arith.constant 0 : index
    %c0_8 = arith.constant 0 : index
    %7 = vector.load %arg1[%c0_6, %c0_7, %c0_8] : memref<1x36x256xf32, #tpu.memory_space<vmem>>, vector<1x36x256xf32>
    %8 = vector.shape_cast %7 : vector<1x36x256xf32> to vector<36x256xf32>
    %cst_9 = arith.constant dense<0.000000e+00> : vector<8x256xf32>
    %9 = tpu.matmul %6, %8, %cst_9 {dimension_numbers = #tpu.dot_dimension_numbers<[1], [0], [0], [1], [0, 0, 1, 1], [], []>} : vector<8x36xf32>, vector<36x256xf32>, vector<8x256xf32> -> vector<8x256xf32>
    %c0_10 = arith.constant 0 : index
    %c0_11 = arith.constant 0 : index
    %10 = vector.load %arg5[%c0_10, %c0_11] : memref<8x1xf32, #tpu.memory_space<vmem>>, vector<8x1xf32>
    %11 = vector.broadcast %10 : vector<8x1xf32> to vector<8x256xf32>
    %12 = arith.addf %9, %11 : vector<8x256xf32>
    %c0_12 = arith.constant 0 : index
    %c0_13 = arith.constant 0 : index
    %c0_14 = arith.constant 0 : index
    %13 = vector.load %arg6[%c0_12, %c0_13, %c0_14] : memref<1x8x256xf32, #tpu.memory_space<vmem>>, vector<1x8x256xf32>
    %14 = vector.shape_cast %13 : vector<1x8x256xf32> to vector<8x256xf32>
    %15 = vector.shape_cast %12 : vector<8x256xf32> to vector<1x8x256xf32>
    tpu.vector_store %arg6[%c0_12, %c0_13, %c0_14], %15 {strides = array<i32>} : memref<1x8x256xf32, #tpu.memory_space<vmem>>, vector<1x8x256xf32>,
    return
  }
  func.func @transform_0(%arg0: i32) -> (i32, i32, i32) {
    %c0_i32 = arith.constant 0 : i32
    %c0_i32_0 = arith.constant 0 : i32
    %c0_i32_1 = arith.constant 0 : i32
    return %arg0, %c0_i32, %c0_i32_0 : i32, i32, i32
  }
  func.func @transform_1(%arg0: i32) -> (i32, i32) {
    %c0_i32 = arith.constant 0 : i32
    %c0_i32_0 = arith.constant 0 : i32
    %c0_i32_1 = arith.constant 0 : i32
    return %c0_i32, %c0_i32_0 : i32, i32
  }
  func.func @transform_2(%arg0: i32) -> (i32, i32) {
    %c0_i32 = arith.constant 0 : i32
    %c0_i32_0 = arith.constant 0 : i32
    %c0_i32_1 = arith.constant 0 : i32
    return %c0_i32, %c0_i32_0 : i32, i32
  }
  func.func @transform_3(%arg0: i32) -> (i32, i32) {
    %c0_i32 = arith.constant 0 : i32
    %c0_i32_0 = arith.constant 0 : i32
    %c0_i32_1 = arith.constant 0 : i32
    return %c0_i32, %c0_i32_0 : i32, i32
  }
  func.func @transform_4(%arg0: i32) -> (i32, i32) {
    %c0_i32 = arith.constant 0 : i32
    %c0_i32_0 = arith.constant 0 : i32
    %c0_i32_1 = arith.constant 0 : i32
    return %c0_i32, %c0_i32_0 : i32, i32
  }
  func.func @transform_5(%arg0: i32) -> (i32, i32, i32) {
    %c0_i32 = arith.constant 0 : i32
    %c0_i32_0 = arith.constant 0 : i32
    %c0_i32_1 = arith.constant 0 : i32
    return %arg0, %c0_i32, %c0_i32_0 : i32, i32, i32
  }
}

</mosaic_0001>

<bundles_post_ra>
// kernel: tpu_custom_call.1
= control target key start
LH: loop header
LB: loop body
LE: loop exit
PB: predicated region body
PF: predicated region fallthrough
CT: control target
= control target key end

     0   :  { %10 = vsyncpa [#allocation3], 0  ;;  %s767_s0 = inlined_call_operand.vmem [shape: f32[2,36,256], index: 0, kind: input, shape index: {}]   ;;  %s768_s1 = inlined_call_operand.vmem [shape: f32[8,36], index: 1, kind: input, shape index: {}]   ;;  %s769_s2 = inlined_call_operand.vmem [shape: f32[4,36], index: 2, kind: input, shape index: {}]   ;;  %s770_s3 = inlined_call_operand.vmem [shape: f32[8,4], index: 3, kind: input, shape index: {}]   ;;  %s771_s4 = inlined_call_operand.vmem [shape: f32[8,1], index: 4, kind: input, shape index: {}]   ;;  %s772_s5 = inlined_call_operand.hbm [shape: f32[2,8,256], index: 5, kind: output, shape index: {}]  }
   0x1   :  { %12 = vsyncpa [#allocation3 + $0x1], 0  ;;  %s652_s18 = smov 0   ;;  %s654_s19 = smov 0  }
   0x2   :  { %s656_s20 = smov 0   ;;  %s658_s21 = smov 0  }
   0x3 LB: > { %s673_s22 = sadd.s32 4294967295, %s616_s21   ;;  %s478_s23 = sadd.s32 4294967294, %s616_s21   ;;  %s616_s21 = sphi %s658_s21, %s778_s21   ;;  %s612_s20 = sphi %s656_s20, %s777_s20   ;;  %s608_s19 = sphi %s654_s19, %s776_s19   ;;  %s604_s18 = sphi %s652_s18, %s775_s18  }
   0x4   : > { %s677_s24 = sadd.s32 1, %s616_s21   ;;  %s135_s25 = sadd.s32 1, %s612_s20 }
   0x5   : > { %s132_s26 = ssub.s32 %s616_s21, %s677_s24  ;;  %p145_p0 = scmp.ne.s32.totalorder %s612_s20, %s608_s19 }
   0x6   : > { %p133_p1 = scmp.eq.s32.totalorder %s132_s26, 0  ;;  %p146_p2 = scmp.eq.s32.totalorder %s673_s22, 1 }
   0x7   : > { %p151_p3 = scmp.ne.s32.totalorder %s608_s19, %s604_s18  ;;  %p152_p4 = scmp.eq.s32.totalorder %s478_s23, 1 }
   0x8   : > { %s688_s27 = scalar_select %p133_p1, %s612_s20, %s135_s25  }
   0x9   : > { %p690_p5 = por %p146_p2, %p145_p0  ;;  %p694_p6 = por %p152_p4, %p151_p3 }
   0xa   : > { %p481_p7 = scmp.ge.s32.totalorder %s616_s21, 1  ;;  %p190_p8 = scmp.lt.s32.totalorder %s616_s21, 3 }
   0xc   : > { %p191_p9 = pnand %p481_p7, %p190_p8 }
   0xd   : > { %v224_v0 = vld [vmem:[%s769_s2] sm:$0xf] (!%p191_p9)  ;;  %vm229_vm0 = vcmask (!%p191_p9), 1043456   ;;  %v618_v2 = vmov (!%p191_p9), 0.0   ;;  %vm619_vm1 = vmmov (!%p191_p9), 0   ;;  %vm225_vm2 = vcmask (!%p191_p9), 31744  }
   0xe   : > { %194 = sbr.rel (%p191_p9) target bundleno = 459 (0x1cb), region = 40  ;;  %v223_v1 = vld [vmem:[%s770_s3] sm:$0xff] (!%p191_p9)  ;;  %497 = vmatprep.subr.mxu0 (!%p191_p9), %v618_v2  ;;  %499 = vmatprep.mubr.msk.f32.mxu0 (!%p191_p9), %vm619_vm1, %v618_v2  ;;  %p218_p10 = scmp.lt.s32.totalorder (!%p191_p9), %s673_s22, 1  ;;  %v620_v18 = vmov (!%p191_p9), 0   ;;  %vm321_vm3 = vcmask (!%p191_p9), 293888  }
   0xf   : > { %498 = vmatpush3.msk.msra.mxu0 (!%p191_p9), %vm229_vm0, %v224_v0  ;;  %395 = vmatprep.mubr.f32.mxu1 (!%p191_p9), %v618_v2  ;;  %v315_v17 = vld [vmem:[%s771_s4] sm:$0xff] (!%p191_p9)  ;;  %s215_s23 = sand.u32 (!%p191_p9), 1, %s608_s19   ;;  %s494_s26 = sshll.u32 (!%p191_p9), %s673_s22, 8 }
  0x10   : > { %500 = vmatmul.mubr.msk.f32.vlgmr.msra.gmra.mrb[0].mxu0 (!%p191_p9), %vm225_vm2, %v223_v1  ;;  %553 = vset.pattern.permute.xlu0 (!%p191_p9), %v620_v18  ;;  %v303_v19 = vld [vmem:[%s768_s1] sm:$0xff] (!%p191_p9)  ;;  %s482_s25 = sshll.u32 (!%p191_p9), %s215_s23, 4  ;;  %s621_s11 = smov (!%p191_p9), [#allocation2]  }
  0x11   : > { %318 = vperm.xlu0 (!%p191_p9), %553, %v315_v17   ;;  %s217_s30 = scalar_lea.vmem (!%p191_p9), [#allocation2], %s482_s25  ;;  %s558_s12 = sshll.u32 (!%p191_p9), %s621_s11, 4  ;;  %s559_s12 = int_to_ptr.vmem [resolvable:$false] %s558_s12 }
  0x12   : > { %s419_s6 = sshll.u32 (!%p191_p9), %s217_s30, 4  ;;  %s727_s6 = int_to_ptr.vmem [resolvable:$true] %s419_s6 }
  0x13   : > { %p561_p0 = scmp.lt.s32.totalorder (!%p191_p9), %s727_s6, %s559_s12 }
  0x15   : > { %s219_s9 = scalar_select %p218_p10, %s673_s22, 1 }
  0x16   : > { %s554_s22 = scalar_lea.vmem %s727_s6, 256 }
  0x17   : > { %s510_s10 = smul.u32 80, %s219_s9  ;;  %s725_s9 = scalar_lea.hbm %s772_s5, %s494_s26 }
  0x18   : > { %p555_p11 = scmp.ne.s32.totalorder %s727_s6, %s554_s22 }
  0x19   : > { %s222_s13 = scalar_lea.vmem %s767_s0, %s510_s10  ;;  %s405_s10 = scalar_lea.sflag [#allocation3], %s215_s23 }
  0x1a   : > { %v306_v3 = vld [vmem:[%s222_s13 + $0x8] sm:$0xff]  ;;  %v308_v4 = vld [vmem:[%s222_s13 + $0x18] sm:$0xff]  ;;  %v305_v5 = vld [vmem:[%s222_s13] sm:$0xff]  ;;  %p556_p12 = pnand %p555_p11, %p690_p5 }
  0x1b   : > { %v502_v6 = vpack.c.bf16 %v308_v4, %v306_v3  ;;  %v307_v7 = vld [vmem:[%s222_s13 + $0x10] sm:$0xff]  ;;  %v310_v8 = vld [vmem:[%s222_s13 + $0x28] sm:$0xff]  ;;  %v312_v9 = vld [vmem:[%s222_s13 + $0x38] sm:$0xff] }
  0x1c   : > { %v504_v10 = vpack.c.bf16 %v307_v7, %v305_v5  ;;  %v506_v11 = vpack.c.bf16 %v312_v9, %v310_v8  ;;  %v309_v12 = vld [vmem:[%s222_s13 + $0x20] sm:$0xff]  ;;  %v311_v13 = vld [vmem:[%s222_s13 + $0x30] sm:$0xff]  ;;  %v314_v15 = vld [vmem:[%s222_s13 + $0x48] sm:$0xf]  ;;  %p557_p13 = pneg %p556_p12 }
  0x1d   : > { %503 = vmatprep.subr.bf16.mxu1 %v502_v6  ;;  %v508_v14 = vpack.c.bf16 %v311_v13, %v309_v12  ;;  %v313_v16 = vld [vmem:[%s222_s13 + $0x40] sm:$0xf]  ;;  %s560_s13 = scalar_lea.vmem %s559_s12, 512 }
  0x1e   : > { %505 = vmatpush1.bf16.msra.mxu1 %v504_v10  ;;  %p562_p1 = scmp.lt.s32.totalorder %s560_s13, %s554_s22 }
  0x1f   : > { %507 = vmatprep.subr.bf16.mxu1 %v506_v11 }
  0x20   : > { %p563_p2 = por %p562_p1, %p561_p0 }
  0x22   : > { %509 = vmatpush1.bf16.msra.mxu1 %v508_v14  ;;  %p564_p3 = pnand %p563_p2, %p557_p13 }
  0x23   : > { %486 = vmatprep.subr.msk.mxu1 %vm229_vm0, %v314_v15 }
  0x26   : > { %487 = vmatpush1.msk.msra.mxu1 %vm229_vm0, %v313_v16 }
  0x90   : > { %v319_v23 = vpop.permute.xlu0 %318 }
  0xe3   : > { %v299_v20 = vpop.f32.mrb[0].mxu0 }
  0xe4   : > { %v304_v21 = vadd.f32 %v303_v19, %v299_v20  ;;  %v501_v22 = vpop.f32.mrb[1].mxu0 }
  0xe6   : > { %488 = vmatmul.mubr.msk.f32.vlgmr.msra.gmra.mrb[0].mxu1 %vm321_vm3, %v304_v21 }
 0x1b9   : > { %v397_v24 = vpop.f32.mrb[0].mxu1 }
 0x1ba   : > { %v398_v25 = vadd.f32 %v397_v24, %v319_v23  ;;  %v399_v26 = vpop.f32.mrb[1].mxu1 }
 0x1bb   : > { %v400_v27 = vadd.f32 %v399_v26, %v319_v23 }
 0x1bc   : > { %402 = vst [vmem:[%s217_s30] sm:$0xff] %v398_v25 }
 0x1bd   : > { %403 = vst [vmem:[%s217_s30 + $0x8] sm:$0xff] %v400_v27 }
 0x1be   : > { %567 = shalt.err (!%p564_p3)
}
 0x1bf   : > { %s568_s14 = scalar_lea.hbm %s725_s9, 256  ;;  %s572_s17 = scalar_lea.hbm %s772_s5, 512 }
 0x1c0   : > { %p569_p4 = scmp.ne.s32.totalorder %s725_s9, %s568_s14  ;;  %p573_p9 = scmp.lt.u32.totalorder %s725_s9, %s772_s5 }
 0x1c1   : > { %p574_p10 = scmp.lt.u32.totalorder %s572_s17, %s568_s14  ;;  %p576_p12 = scmp.lt.u32.totalorder %s568_s14, %s725_s9 }
 0x1c2   : > { %p570_p7 = pnand %p569_p4, %p690_p5 }
 0x1c3   : > { %p575_p11 = por %p574_p10, %p573_p9 }
 0x1c4   : > { %p571_p8 = pneg %p570_p7 }
 0x1c5   : > { %p577_p13 = por %p576_p12, %p575_p11 }
 0x1c7   : > { %p578_p0 = pnand %p577_p13, %p571_p8 }
 0x1c9   : > { %581 = shalt.err (!%p578_p0)
}
 0x1ca   : > { %511 = dma.vmem_to_hbm [thread:$0]  (%p690_p5), %s727_s6, 256, %s725_s9, %s405_s10  }
 0x1cb PF: > { %p517_p1 = scmp.ge.s32.totalorder %s616_s21, 2  ;;  %s431_s26 = sand.u32 1, %s604_s18  }
 0x1cc   : > { %s432_s30 = scalar_lea.sflag [#allocation3], %s431_s26 }
 0x1cd   : > { %p514_p2 = pnand %p517_p1, %p694_p6 }
 0x1cf   : > { %599 = dma.done.wait (!%p514_p2), %s432_s30, 256  }
 0x1d0   : > { %601 = vsyncadd (!%p514_p2), %s432_s30, 4294967040  ;;  %p15_p3 = scmp.ge.s32.totalorder %s677_s24, 4   ;;  %s775_s18 = smov %s608_s19 }
 0x1d1   : > { %s776_s19 = smov %s612_s20  ;;  %s777_s20 = smov %s688_s27 }
 0x1d2   : > { %s778_s21 = smov %s677_s24  ;;  %17 = sbr.rel (!%p15_p3) target bundleno = 3 (0x3), region = 75 }
 0x1d9   :  { %437 = vsyncpa [#allocation3], 1 }
 0x1da   :  { %439 = vsyncpa [#allocation3 + $0x1], 1 }

</bundles_post_ra>
